<compile_context>
chip_gen: v7x
topology: tpu7x:2x2x1
jax: 0.10.0
libtpu: 0.0.40
codegen_flags: <defaults>
</compile_context>

<pallas_src>
import functools
import math

import jax
import jax.numpy as jnp
from jax.experimental import pallas as pl
from jax.experimental.pallas import tpu as pltpu


def _satlu_kernel(x_ref, o_ref, *, lower, upper):
    x = x_ref[...]
    # NOTE: fractional bounds are truncated for integer dtypes (activations are float).
    lo = jnp.asarray(lower, x.dtype)
    hi = jnp.asarray(upper, x.dtype)
    o_ref[...] = jnp.minimum(jnp.maximum(x, lo), hi)  # VPU elementwise clamp


_LANE_CANDIDATES = (4096, 2048, 1024, 512, 256, 128)
_ROW_QUANTUM = 32          # multiples of 32 rows keep (8,128)/(16,128)/(32,128) packing aligned
_SMALL_BYTES = 256 * 1024  # below this a single block wins (per-step overhead > overlap gain)


@functools.lru_cache(maxsize=None)
def _tpu_block_config():
    """(target_block_bytes, vmem_limit_bytes) tuned per TPU generation."""
    kind = ""
    try:
        kind = jax.devices()[0].device_kind.lower()
    except Exception:  # unknown backend: fall through to the conservative default
        pass
    if "v7" in kind:
        # 3.2 TB/s HBM: 6 MiB blocks keep the ~0.35 us/step overhead < 10% of DMA time.
        # Double-buffered in+out = 4 x 6 MiB = 24 MiB; raise the scoped-VMEM limit
        # explicitly (64 MiB physical) to leave headroom for internal scratch.
        return 6 * 1024 * 1024, 48 * 1024 * 1024
    if "v6" in kind:
        # 4 x 4 MiB = 16 MiB working set fits the 32 MiB default scoped VMEM, no flags.
        return 4 * 1024 * 1024, None
    # v5e (and anything unknown): 2 MiB blocks; 8 MiB working set fits the 16 MiB default.
    return 2 * 1024 * 1024, None


def _pick_lanes(n):
    """Largest candidate lane width dividing n exactly (None if n % 128 != 0)."""
    for cand in _LANE_CANDIDATES:
        if n % cand == 0:
            return cand
    return None


def _choose_tiling(rows, lanes, itemsize, target_block_bytes):
    """Pick (tile_rows, grid_rows) for the (rows, lanes) slab."""
    total_bytes = rows * lanes * itemsize
    if total_bytes <= _SMALL_BYTES or rows <= _ROW_QUANTUM:
        # Single full-array block (block dims == array dims is always legal).
        return rows, 1

    q = _ROW_QUANTUM
    rows_q = pl.cdiv(rows, q)
    block_q_bytes = lanes * itemsize * q
    tile_q = max(1, target_block_bytes // block_q_bytes)
    grid_r = pl.cdiv(rows_q, tile_q)
    # >= 4 steps restores input/output DMA overlap (software pipeline); an even step
    # count balances the parallel row-block axis across both v7x TensorCores (best effort).
    grid_r = max(grid_r, min(4, rows_q))
    if grid_r % 2 and grid_r < rows_q:
        grid_r += 1
    tile_q = pl.cdiv(rows_q, grid_r)
    tile_r = tile_q * q
    grid_r = pl.cdiv(rows, tile_r)  # last block may be partial; Pallas masks it
    return tile_r, grid_r


def _satlu_2d(xf, n, lanes, lower, upper):
    """Clamp a flat length-n array (n divisible by `lanes`) with the Pallas kernel."""
    rows = n // lanes
    itemsize = jnp.dtype(xf.dtype).itemsize
    target_block_bytes, vmem_limit = _tpu_block_config()
    tile_r, grid_r = _choose_tiling(rows, lanes, itemsize, target_block_bytes)

    params = {"dimension_semantics": ("parallel",)}  # row blocks are independent
    if vmem_limit is not None:
        params["vmem_limit_bytes"] = vmem_limit

    out2 = pl.pallas_call(
        functools.partial(_satlu_kernel, lower=lower, upper=upper),
        out_shape=jax.ShapeDtypeStruct((rows, lanes), xf.dtype),
        grid_spec=pltpu.PrefetchScalarGridSpec(
            num_scalar_prefetch=0,
            grid=(grid_r,),
            in_specs=[pl.BlockSpec((tile_r, lanes), lambda i: (i, 0))],
            out_specs=pl.BlockSpec((tile_r, lanes), lambda i: (i, 0)),
        ),
        compiler_params=pltpu.CompilerParams(**params),
    )(xf.reshape(rows, lanes))
    return out2.reshape(-1)


def _clip_plain(x, lower, upper):
    lo = jnp.asarray(lower, x.dtype)
    hi = jnp.asarray(upper, x.dtype)
    return jnp.minimum(jnp.maximum(x, lo), hi)


@functools.partial(jax.jit, static_argnames=("lower", "upper"))
def _satlu_impl(x, lower, upper):
    orig_shape = x.shape
    n = math.prod(orig_shape) if orig_shape else 1
    if n == 0:
        return x

    xf = x.reshape(-1)  # contiguous row-major flatten: metadata only

    lanes = _pick_lanes(n)
    if lanes is not None:
        # Common case: no padding, no extra passes -> exactly 2N bytes of HBM traffic.
        return _satlu_2d(xf, n, lanes, lower, upper).reshape(orig_shape)

    # n not a multiple of 128: run the 128-aligned prefix through the kernel and clamp
    # the (< 128 element) tail inline. Stitching costs one concatenate pass, but this
    # replaces the old jnp.pad + out[:n] round trips; real NCHW activations never hit it.
    prefix = (n // 128) * 128
    if prefix == 0:
        return _clip_plain(x, lower, upper)  # fewer than 128 elements: a kernel isn't worth it
    head = _satlu_2d(xf[:prefix], prefix, _pick_lanes(prefix), lower, upper)
    tail = _clip_plain(xf[prefix:], lower, upper)
    return jnp.concatenate([head, tail]).reshape(orig_shape)


def satlu(x, lower=0.0, upper=1.0):
    """SatLU forward: F.hardtanh(x, min_val=lower, max_val=upper), elementwise.

    Note: when SatLU is embedded inside a larger jitted model, plain jnp.clip at the
    call site lets XLA fuse the clamp into neighbouring ops for free; any standalone
    kernel (this one included) necessarily pays one full HBM read+write pass.
    """
    if lower > upper:
        raise ValueError(f"SatLU requires lower <= upper, got {lower} > {upper}")
    # TODO(synk): `inplace=True` has no JAX equivalent (arrays are immutable); the result
    # is returned out-of-place with identical values. Callers that can donate the input
    # at their jit boundary let XLA reuse the buffer (equivalent of input_output_aliases).
    return _satlu_impl(x, lower=float(lower), upper=float(upper))


if __name__ == "__main__":
    key = jax.random.PRNGKey(0)
    # NCHW activation-like input, values spread outside [0, 1] to exercise clamping.
    x = jax.random.normal(key, (2, 4, 16, 16), dtype=jnp.float32) * 3.0
    y = jax.block_until_ready(satlu(x, lower=0.0, upper=1.0))
    y_ref = jnp.clip(x, 0.0, 1.0)
    assert y.shape == x.shape and y.dtype == x.dtype
    assert bool(jnp.allclose(y, y_ref)), "SatLU Pallas kernel mismatch vs reference"

    # Multi-block path (pipelined grid) with a partial, masked last row-block.
    x_big = jax.random.normal(jax.random.PRNGKey(1), (4, 8, 56, 56), dtype=jnp.float32) * 3.0
    y_big = jax.block_until_ready(satlu(x_big, lower=0.0, upper=1.0))
    assert bool(jnp.allclose(y_big, jnp.clip(x_big, 0.0, 1.0))), "SatLU mismatch (multi-block)"

    # Non-128-divisible element count (prefix kernel + inline tail path).
    x_odd = jax.random.normal(jax.random.PRNGKey(2), (2, 3, 7, 7), dtype=jnp.float32) * 3.0
    y_odd = jax.block_until_ready(satlu(x_odd, lower=-0.5, upper=0.5))
    assert bool(jnp.allclose(y_odd, jnp.clip(x_odd, -0.5, 0.5))), "SatLU mismatch (tail path)"

    print("KERNEL_OK")
</pallas_src>

<mosaic_0001>
module attributes {stable_mosaic.version = 11 : i64} {
  func.func @_satlu_kernel(%arg0: i32, %arg1: memref<1x2048xf32, #tpu.memory_space<vmem>>, %arg2: memref<1x2048xf32, #tpu.memory_space<vmem>>) attributes {dimension_semantics = [#tpu.dimension_semantics<parallel>], iteration_bounds = array<i64: 1>, scalar_prefetch = 0 : i64, scratch_operands = 0 : i64, tpu.core_type = #tpu.core_type<tc>, window_params = [{transform_indices = @transform_0, window_bounds = array<i64: 1, 2048>}, {transform_indices = @transform_1, window_bounds = array<i64: 1, 2048>}]} {
    %c0 = arith.constant 0 : index
    %c0_0 = arith.constant 0 : index
    %0 = vector.load %arg1[%c0, %c0_0] : memref<1x2048xf32, #tpu.memory_space<vmem>>, vector<1x2048xf32>
    %cst = arith.constant 0.000000e+00 : f32
    %1 = vector.broadcast %cst : f32 to vector<1x2048xf32>
    %2 = arith.maximumf %0, %1 : vector<1x2048xf32>
    %cst_1 = arith.constant 1.000000e+00 : f32
    %3 = vector.broadcast %cst_1 : f32 to vector<1x2048xf32>
    %4 = arith.minimumf %2, %3 : vector<1x2048xf32>
    %c0_2 = arith.constant 0 : index
    %c0_3 = arith.constant 0 : index
    %5 = vector.load %arg2[%c0_2, %c0_3] : memref<1x2048xf32, #tpu.memory_space<vmem>>, vector<1x2048xf32>
    tpu.vector_store %arg2[%c0_2, %c0_3], %4 {strides = array<i32>} : memref<1x2048xf32, #tpu.memory_space<vmem>>, vector<1x2048xf32>,
    return
  }
  func.func @transform_0(%arg0: i32) -> (i32, i32) {
    %c0_i32 = arith.constant 0 : i32
    %c0_i32_0 = arith.constant 0 : i32
    return %arg0, %c0_i32 : i32, i32
  }
  func.func @transform_1(%arg0: i32) -> (i32, i32) {
    %c0_i32 = arith.constant 0 : i32
    %c0_i32_0 = arith.constant 0 : i32
    return %arg0, %c0_i32 : i32, i32
  }
}

</mosaic_0001>

<bundles_post_ra>
// kernel: _satlu_impl.1
= control target key start
LH: loop header
LB: loop body
LE: loop exit
PB: predicated region body
PF: predicated region fallthrough
CT: control target
= control target key end

     0   :  { %s42_s0 = inlined_call_operand.vmem [shape: f32[1,2048], index: 0, kind: input, shape index: {}]   ;;  %s43_s1 = inlined_call_operand.vmem [shape: f32[1,2048], index: 1, kind: output, shape index: {}]  }
   0x1   :  { %v8_v0 = vld [vmem:[%s42_s0] sm:$0xff]  ;;  %v9_v1 = vld [vmem:[%s42_s0 + $0x8] sm:$0xff] }
   0x2   :  { %v10_v2 = vmax.f32 %v8_v0, 0.0  ;;  %v11_v3 = vmax.f32 %v9_v1, 0.0 }
   0x4   :  { %v12_v4 = vmin.f32 %v10_v2, 1.0  ;;  %v13_v5 = vmin.f32 %v11_v3, 1.0 }
   0x6   :  { %14 = vst [vmem:[%s43_s1] sm:$0xff] %v12_v4  ;;  %15 = vst [vmem:[%s43_s1 + $0x8] sm:$0xff] %v13_v5 }

</bundles_post_ra>
